<compile_context>
chip_gen: v7x
topology: tpu7x:2x2x1
jax: 0.10.0
libtpu: 0.0.40
codegen_flags: <defaults>
</compile_context>

<pallas_src>
import numpy as np

import jax
import jax.numpy as jnp
from jax import lax
from jax.experimental import pallas as pl
from jax.experimental.pallas import tpu as pltpu


def _make_residual_block_kernel(N, H2, L, KP, pad2, eps):
    ROWS = N * H2
    KD = KP * L
    inv_rows = 1.0 / float(ROWS)

    def kernel(x_ref, w1_ref, w2_ref, g1_ref, bt1_ref, g2_ref, bt2_ref, mavg_ref,
               out_ref, xpad_ref):
        # x_ref    : (N, H2, L)         f32   paired lane-dense activations (2 H rows x W x C on lanes)
        # w*_ref   : (KP*L, L)          bf16  stacked pair-row Toeplitz conv weights
        # g*/bt*   : (1, L)             f32   per-lane tiled BN gamma / beta
        # mavg_ref : (L, L)             f32   lane-group -> channel averaging matrix
        # xpad_ref : (N, H2+2*pad2, L)  bf16  VMEM scratch, pair-row padded activations

        def conv(w_ref):
            # One fused MXU matmul per conv: LHS = lane-concat of the KP vertically
            # shifted pair-row views (contraction depth KP*L).
            taps = [xpad_ref[:, k:k + H2, :] for k in range(KP)]
            lhs = jnp.concatenate(taps, axis=-1).reshape(ROWS, KD)
            return jnp.dot(lhs, w_ref[...], preferred_element_type=jnp.float32)

        def bn_relu(v, g_ref, b_ref):
            # training-mode BatchNorm2d (biased batch statistics), f32 throughout.
            # Single stacked stats dot: rows = [mean_per_lane, E[x^2]_per_lane].
            stats = jnp.concatenate(
                [jnp.sum(v, axis=0, keepdims=True),
                 jnp.sum(v * v, axis=0, keepdims=True)], axis=0) * inv_rows   # (2, L)
            stats = jnp.dot(stats, mavg_ref[...], preferred_element_type=jnp.float32)
            mean, ex2 = stats[0:1, :], stats[1:2, :]
            var = jnp.maximum(ex2 - mean * mean, 0.0)        # clamp >= 0
            inv = lax.rsqrt(var + eps)
            return jnp.maximum((v - mean) * (inv * g_ref[...]) + b_ref[...], 0.0)

        # Zero only the pair-row padding borders once; interiors are always overwritten.
        if pad2 > 0:
            zeros = jnp.zeros((N, pad2, L), jnp.bfloat16)
            xpad_ref[:, :pad2, :] = zeros
            xpad_ref[:, pad2 + H2:, :] = zeros

        # TODO(synk): nn.Dropout2d output is discarded by the reference forward -> omitted.

        x = x_ref[...]                                        # f32 copy kept for residual

        # conv1 -> BN1 -> ReLU   (conv bias dropped: cancels exactly under batch-stat BN)
        xpad_ref[:, pad2:pad2 + H2, :] = x.astype(jnp.bfloat16)      # single bf16 cast
        y = bn_relu(conv(w1_ref), g1_ref, bt1_ref)

        # conv2 (reuse the same padded scratch; border rows still zero)
        xpad_ref[:, pad2:pad2 + H2, :] = y.reshape(N, H2, L).astype(jnp.bfloat16)
        z = conv(w2_ref)

        # residual add -> BN2 -> ReLU
        out = bn_relu(x.reshape(ROWS, L) + z, g2_ref, bt2_ref)
        out_ref[...] = out.reshape(N, H2, L)

    return kernel


def _w_toeplitz_mats(w, W, C, KH, KW, dil, pad):
    """Per-kh W-direction Toeplitz matrices (W*C, W*C); W zero padding folded in.

    M_kh[j*C + ci, wo*C + co] = sum_{kw : j == wo + kw*dil - pad} weight[co, ci, kh, kw]
    """
    WC = W * C
    w = np.asarray(w, np.float32)
    mats = []
    for kh in range(KH):
        m = np.zeros((WC, WC), np.float32)
        for kw in range(KW):
            blk = w[:, :, kh, kw].T          # (Cin, Cout)
            for wo in range(W):
                j = wo + kw * dil - pad
                if 0 <= j < W:
                    m[j * C:(j + 1) * C, wo * C:(wo + 1) * C] += blk
        mats.append(m)
    return mats


def _paired_toeplitz_weights(w, W, C, KH, KW, dil, pad):
    """Stacked pair-row Toeplitz RHS: (KP * 2*W*C, 2*W*C), bf16.

    Two adjacent H rows are packed onto the lane axis (lane = hp*W*C + w*C + c).
    Tap k maps padded pair-row (r + k) to output pair-row r; its 64x64 sub-blocks are
    the per-kh W-Toeplitz matrices placed according to the vertical offset.
    """
    WC = W * C
    L = 2 * WC
    mats = _w_toeplitz_mats(w, W, C, KH, KW, dil, pad)
    pad2 = (pad + 1) // 2                              # pair rows of vertical padding
    t_min = (-pad + 2 * pad2) // 2
    t_max = (1 + (KH - 1) * dil - pad + 2 * pad2) // 2
    KP = t_max - t_min + 1
    blocks = []
    for k in range(KP):
        t = t_min + k
        B = np.zeros((L, L), np.float32)
        for hp_i in range(2):
            for hp_o in range(2):
                num = 2 * (t - pad2) + hp_i - hp_o + pad
                if num % dil == 0:
                    kh = num // dil
                    if 0 <= kh < KH:
                        B[hp_i * WC:(hp_i + 1) * WC, hp_o * WC:(hp_o + 1) * WC] = mats[kh]
        blocks.append(B)
    rhs = np.concatenate(blocks, axis=0)               # (KP*L, L)
    return jnp.asarray(rhs, jnp.bfloat16), KP, pad2


def residual_block_pallas(x_nchw, params, *, kernel_size=3, padding=1, dilation=1,
                          eps=1e-5):
    N, C, H, W = x_nchw.shape
    KH = KW = kernel_size
    assert 2 * padding == dilation * (kernel_size - 1), "spatial size must be preserved"
    assert H % 2 == 0, "H-pair lane packing requires even H"
    L = 2 * W * C
    assert L % 128 == 0, "lane packing assumes 2*W*C is a multiple of 128"
    H2 = H // 2

    # NCHW -> NHWC -> paired lane-dense (N, H/2, 2*W*C).  TODO(synk): in a real model,
    # keep activations lane-dense across layers instead of relaying out here.
    x_l = jnp.transpose(x_nchw, (0, 2, 3, 1)).reshape(N, H2, L).astype(jnp.float32)

    w1s, KP, pad2 = _paired_toeplitz_weights(params["w1"], W, C, KH, KW, dilation, padding)
    w2s, KP2, pad2b = _paired_toeplitz_weights(params["w2"], W, C, KH, KW, dilation, padding)
    assert KP == KP2 and pad2 == pad2b

    # Conv biases b1/b2 are intentionally NOT passed: per-channel constants cancel
    # exactly under training-mode BatchNorm with batch statistics.
    g1 = jnp.tile(params["g1"].astype(jnp.float32), 2 * W).reshape(1, L)
    bt1 = jnp.tile(params["bt1"].astype(jnp.float32), 2 * W).reshape(1, L)
    g2 = jnp.tile(params["g2"].astype(jnp.float32), 2 * W).reshape(1, L)
    bt2 = jnp.tile(params["bt2"].astype(jnp.float32), 2 * W).reshape(1, L)
    # Lane-group (hp, w) averaging matrix: per-lane stats -> per-channel stats broadcast.
    mavg = jnp.kron(jnp.ones((2 * W, 2 * W), jnp.float32) / float(2 * W),
                    jnp.eye(C, dtype=jnp.float32))

    def full_spec(shape):
        nd = len(shape)
        return pl.BlockSpec(shape, lambda i, _nd=nd: (0,) * _nd)

    kernel = _make_residual_block_kernel(N, H2, L, KP, pad2, eps)

    out_l = pl.pallas_call(
        kernel,
        grid=(1,),
        in_specs=[
            full_spec(x_l.shape),
            full_spec(w1s.shape), full_spec(w2s.shape),
            full_spec(g1.shape), full_spec(bt1.shape),
            full_spec(g2.shape), full_spec(bt2.shape),
            full_spec(mavg.shape),
        ],
        out_specs=full_spec((N, H2, L)),
        out_shape=jax.ShapeDtypeStruct((N, H2, L), jnp.float32),
        scratch_shapes=[pltpu.VMEM((N, H2 + 2 * pad2, L), jnp.bfloat16)],
        compiler_params=pltpu.CompilerParams(
            dimension_semantics=("arbitrary",),
            vmem_limit_bytes=32 * 1024 * 1024),
    )(x_l, w1s, w2s, g1, bt1, g2, bt2, mavg)

    # (N, H/2, 2*W*C) -> NCHW
    return jnp.transpose(out_l.reshape(N, H, W, C), (0, 3, 1, 2))


def residual_block_ref(x, params, *, kernel_size=3, padding=1, dilation=1, eps=1e-5):
    """Pure-JAX f32 reference (NCHW), mirrors the PyTorch forward."""
    def conv(inp, w, b):
        y = lax.conv_general_dilated(
            inp, w, window_strides=(1, 1),
            padding=[(padding, padding), (padding, padding)],
            rhs_dilation=(dilation, dilation),
            dimension_numbers=("NCHW", "OIHW", "NCHW"))
        return y + b.reshape(1, -1, 1, 1)

    def bn(inp, g, b):
        mean = jnp.mean(inp, axis=(0, 2, 3), keepdims=True)
        var = jnp.mean((inp - mean) ** 2, axis=(0, 2, 3), keepdims=True)
        return (inp - mean) / jnp.sqrt(var + eps) * g.reshape(1, -1, 1, 1) + b.reshape(1, -1, 1, 1)

    y = conv(x, params["w1"], params["b1"])
    y = jnp.maximum(bn(y, params["g1"], params["bt1"]), 0.0)
    y = conv(y, params["w2"], params["b2"])
    out = x + y
    out = jnp.maximum(bn(out, params["g2"], params["bt2"]), 0.0)
    return out


if __name__ == "__main__":
    key = jax.random.PRNGKey(0)
    N, C, H, W = 2, 4, 16, 16
    KS, PAD, DIL = 3, 1, 1

    keys = jax.random.split(key, 9)
    x = jax.random.normal(keys[0], (N, C, H, W), jnp.float32)
    params = {
        "w1": 0.2 * jax.random.normal(keys[1], (C, C, KS, KS), jnp.float32),
        "b1": 0.1 * jax.random.normal(keys[2], (C,), jnp.float32),
        "g1": 1.0 + 0.1 * jax.random.normal(keys[3], (C,), jnp.float32),
        "bt1": 0.1 * jax.random.normal(keys[4], (C,), jnp.float32),
        "w2": 0.2 * jax.random.normal(keys[5], (C, C, KS, KS), jnp.float32),
        "b2": 0.1 * jax.random.normal(keys[6], (C,), jnp.float32),
        "g2": 1.0 + 0.1 * jax.random.normal(keys[7], (C,), jnp.float32),
        "bt2": 0.1 * jax.random.normal(keys[8], (C,), jnp.float32),
    }

    out = residual_block_pallas(x, params, kernel_size=KS, padding=PAD, dilation=DIL)
    out = jax.block_until_ready(out)

    ref = residual_block_ref(x, params, kernel_size=KS, padding=PAD, dilation=DIL)
    ref = jax.block_until_ready(ref)

    assert out.shape == (N, C, H, W)
    # bf16 MXU operands (f32 accumulation) vs. the pure-f32 reference -> loose tolerance.
    assert jnp.allclose(out, ref, atol=5e-2, rtol=5e-2), float(jnp.max(jnp.abs(out - ref)))
    print("KERNEL_OK")
</pallas_src>

<mosaic_0001>
module attributes {stable_mosaic.version = 11 : i64} {
  func.func @kernel(%arg0: i32, %arg1: memref<2x8x128xf32, #tpu.memory_space<vmem>>, %arg2: memref<384x128xbf16, #tpu.memory_space<vmem>>, %arg3: memref<384x128xbf16, #tpu.memory_space<vmem>>, %arg4: memref<1x128xf32, #tpu.memory_space<vmem>>, %arg5: memref<1x128xf32, #tpu.memory_space<vmem>>, %arg6: memref<1x128xf32, #tpu.memory_space<vmem>>, %arg7: memref<1x128xf32, #tpu.memory_space<vmem>>, %arg8: memref<128x128xf32, #tpu.memory_space<vmem>>, %arg9: memref<2x8x128xf32, #tpu.memory_space<vmem>>, %arg10: memref<2x10x128xbf16, #tpu.memory_space<vmem>>) attributes {dimension_semantics = [#tpu.dimension_semantics<arbitrary>], iteration_bounds = array<i64: 1>, scalar_prefetch = 0 : i64, scratch_operands = 1 : i64, tpu.core_type = #tpu.core_type<tc>, window_params = [{pipeline_mode = #tpu.pipeline_mode<synchronous>, transform_indices = @transform_0, window_bounds = array<i64: 2, 8, 128>}, {pipeline_mode = #tpu.pipeline_mode<synchronous>, transform_indices = @transform_1, window_bounds = array<i64: 384, 128>}, {pipeline_mode = #tpu.pipeline_mode<synchronous>, transform_indices = @transform_2, window_bounds = array<i64: 384, 128>}, {pipeline_mode = #tpu.pipeline_mode<synchronous>, transform_indices = @transform_3, window_bounds = array<i64: 1, 128>}, {pipeline_mode = #tpu.pipeline_mode<synchronous>, transform_indices = @transform_4, window_bounds = array<i64: 1, 128>}, {pipeline_mode = #tpu.pipeline_mode<synchronous>, transform_indices = @transform_5, window_bounds = array<i64: 1, 128>}, {pipeline_mode = #tpu.pipeline_mode<synchronous>, transform_indices = @transform_6, window_bounds = array<i64: 1, 128>}, {pipeline_mode = #tpu.pipeline_mode<synchronous>, transform_indices = @transform_7, window_bounds = array<i64: 128, 128>}, {pipeline_mode = #tpu.pipeline_mode<synchronous>, transform_indices = @transform_8, window_bounds = array<i64: 2, 8, 128>}]} {
    %cst = arith.constant 0.000000e+00 : bf16
    %0 = vector.broadcast %cst : bf16 to vector<2x1x128xbf16>
    %c0 = arith.constant 0 : index
    %c0_0 = arith.constant 0 : index
    %c0_1 = arith.constant 0 : index
    %1 = vector.load %arg10[%c0, %c0_0, %c0_1] : memref<2x10x128xbf16, #tpu.memory_space<vmem>>, vector<2x1x128xbf16>
    tpu.vector_store %arg10[%c0, %c0_0, %c0_1], %0 {strides = array<i32>} : memref<2x10x128xbf16, #tpu.memory_space<vmem>>, vector<2x1x128xbf16>,
    %c0_2 = arith.constant 0 : index
    %c9 = arith.constant 9 : index
    %c0_3 = arith.constant 0 : index
    %2 = vector.load %arg10[%c0_2, %c9, %c0_3] : memref<2x10x128xbf16, #tpu.memory_space<vmem>>, vector<2x1x128xbf16>
    tpu.vector_store %arg10[%c0_2, %c9, %c0_3], %0 {strides = array<i32>} : memref<2x10x128xbf16, #tpu.memory_space<vmem>>, vector<2x1x128xbf16>,
    %c0_4 = arith.constant 0 : index
    %c0_5 = arith.constant 0 : index
    %c0_6 = arith.constant 0 : index
    %3 = vector.load %arg1[%c0_4, %c0_5, %c0_6] : memref<2x8x128xf32, #tpu.memory_space<vmem>>, vector<2x8x128xf32>
    %4 = arith.truncf %3 : vector<2x8x128xf32> to vector<2x8x128xbf16>
    %c0_7 = arith.constant 0 : index
    %c1 = arith.constant 1 : index
    %c0_8 = arith.constant 0 : index
    %5 = vector.load %arg10[%c0_7, %c1, %c0_8] : memref<2x10x128xbf16, #tpu.memory_space<vmem>>, vector<2x8x128xbf16>
    tpu.vector_store %arg10[%c0_7, %c1, %c0_8], %4 {strides = array<i32>} : memref<2x10x128xbf16, #tpu.memory_space<vmem>>, vector<2x8x128xbf16>,
    %c0_9 = arith.constant 0 : index
    %c0_10 = arith.constant 0 : index
    %c0_11 = arith.constant 0 : index
    %6 = vector.load %arg10[%c0_9, %c0_10, %c0_11] : memref<2x10x128xbf16, #tpu.memory_space<vmem>>, vector<2x8x128xbf16>
    %c0_12 = arith.constant 0 : index
    %c1_13 = arith.constant 1 : index
    %c0_14 = arith.constant 0 : index
    %7 = vector.load %arg10[%c0_12, %c1_13, %c0_14] : memref<2x10x128xbf16, #tpu.memory_space<vmem>>, vector<2x8x128xbf16>
    %c0_15 = arith.constant 0 : index
    %c2 = arith.constant 2 : index
    %c0_16 = arith.constant 0 : index
    %8 = vector.load %arg10[%c0_15, %c2, %c0_16] : memref<2x10x128xbf16, #tpu.memory_space<vmem>>, vector<2x8x128xbf16>
    %9 = tpu.concatenate %6, %7, %8 in 2 : vector<2x8x128xbf16>, vector<2x8x128xbf16>, vector<2x8x128xbf16> -> vector<2x8x384xbf16>
    %10 = vector.shape_cast %9 : vector<2x8x384xbf16> to vector<16x384xbf16>
    %c0_17 = arith.constant 0 : index
    %c0_18 = arith.constant 0 : index
    %11 = vector.load %arg2[%c0_17, %c0_18] : memref<384x128xbf16, #tpu.memory_space<vmem>>, vector<384x128xbf16>
    %cst_19 = arith.constant dense<0.000000e+00> : vector<16x128xf32>
    %12 = tpu.matmul %10, %11, %cst_19 {dimension_numbers = #tpu.dot_dimension_numbers<[1], [0], [0], [1], [0, 0, 1, 1], [], []>} : vector<16x384xbf16>, vector<384x128xbf16>, vector<16x128xf32> -> vector<16x128xf32>
    %cst_20 = arith.constant dense<0.000000e+00> : vector<128xf32>
    %13 = vector.multi_reduction <add>, %12, %cst_20 [0] : vector<16x128xf32> to vector<128xf32>
    %14 = vector.shape_cast %13 : vector<128xf32> to vector<1x128xf32>
    %15 = arith.mulf %12, %12 : vector<16x128xf32>
    %cst_21 = arith.constant dense<0.000000e+00> : vector<128xf32>
    %16 = vector.multi_reduction <add>, %15, %cst_21 [0] : vector<16x128xf32> to vector<128xf32>
    %17 = vector.shape_cast %16 : vector<128xf32> to vector<1x128xf32>
    %18 = tpu.concatenate %14, %17 in 0 : vector<1x128xf32>, vector<1x128xf32> -> vector<2x128xf32>
    %cst_22 = arith.constant 6.250000e-02 : f32
    %19 = vector.broadcast %cst_22 : f32 to vector<2x128xf32>
    %20 = arith.mulf %18, %19 : vector<2x128xf32>
    %c0_23 = arith.constant 0 : index
    %c0_24 = arith.constant 0 : index
    %21 = vector.load %arg8[%c0_23, %c0_24] : memref<128x128xf32, #tpu.memory_space<vmem>>, vector<128x128xf32>
    %cst_25 = arith.constant dense<0.000000e+00> : vector<2x128xf32>
    %22 = tpu.matmul %20, %21, %cst_25 {dimension_numbers = #tpu.dot_dimension_numbers<[1], [0], [0], [1], [0, 0, 1, 1], [], []>} : vector<2x128xf32>, vector<128x128xf32>, vector<2x128xf32> -> vector<2x128xf32>
    %23 = vector.extract_strided_slice %22 {offsets = [0, 0], sizes = [1, 128], strides = [1, 1]} : vector<2x128xf32> to vector<1x128xf32>
    %24 = vector.extract_strided_slice %22 {offsets = [1, 0], sizes = [1, 128], strides = [1, 1]} : vector<2x128xf32> to vector<1x128xf32>
    %25 = arith.mulf %23, %23 : vector<1x128xf32>
    %26 = arith.subf %24, %25 : vector<1x128xf32>
    %cst_26 = arith.constant 0.000000e+00 : f32
    %27 = vector.broadcast %cst_26 : f32 to vector<1x128xf32>
    %28 = arith.maximumf %26, %27 : vector<1x128xf32>
    %cst_27 = arith.constant 9.99999974E-6 : f32
    %29 = vector.broadcast %cst_27 : f32 to vector<1x128xf32>
    %30 = arith.addf %28, %29 : vector<1x128xf32>
    %31 = math.rsqrt %30 : vector<1x128xf32>
    %32 = vector.broadcast %23 : vector<1x128xf32> to vector<16x128xf32>
    %33 = arith.subf %12, %32 : vector<16x128xf32>
    %c0_28 = arith.constant 0 : index
    %c0_29 = arith.constant 0 : index
    %34 = vector.load %arg4[%c0_28, %c0_29] : memref<1x128xf32, #tpu.memory_space<vmem>>, vector<1x128xf32>
    %35 = arith.mulf %31, %34 : vector<1x128xf32>
    %36 = vector.broadcast %35 : vector<1x128xf32> to vector<16x128xf32>
    %37 = arith.mulf %33, %36 : vector<16x128xf32>
    %c0_30 = arith.constant 0 : index
    %c0_31 = arith.constant 0 : index
    %38 = vector.load %arg5[%c0_30, %c0_31] : memref<1x128xf32, #tpu.memory_space<vmem>>, vector<1x128xf32>
    %39 = vector.broadcast %38 : vector<1x128xf32> to vector<16x128xf32>
    %40 = arith.addf %37, %39 : vector<16x128xf32>
    %cst_32 = arith.constant 0.000000e+00 : f32
    %41 = vector.broadcast %cst_32 : f32 to vector<16x128xf32>
    %42 = arith.maximumf %40, %41 : vector<16x128xf32>
    %43 = vector.shape_cast %42 : vector<16x128xf32> to vector<2x8x128xf32>
    %44 = arith.truncf %43 : vector<2x8x128xf32> to vector<2x8x128xbf16>
    %c0_33 = arith.constant 0 : index
    %c1_34 = arith.constant 1 : index
    %c0_35 = arith.constant 0 : index
    %45 = vector.load %arg10[%c0_33, %c1_34, %c0_35] : memref<2x10x128xbf16, #tpu.memory_space<vmem>>, vector<2x8x128xbf16>
    tpu.vector_store %arg10[%c0_33, %c1_34, %c0_35], %44 {strides = array<i32>} : memref<2x10x128xbf16, #tpu.memory_space<vmem>>, vector<2x8x128xbf16>,
    %c0_36 = arith.constant 0 : index
    %c0_37 = arith.constant 0 : index
    %c0_38 = arith.constant 0 : index
    %46 = vector.load %arg10[%c0_36, %c0_37, %c0_38] : memref<2x10x128xbf16, #tpu.memory_space<vmem>>, vector<2x8x128xbf16>
    %c0_39 = arith.constant 0 : index
    %c1_40 = arith.constant 1 : index
    %c0_41 = arith.constant 0 : index
    %47 = vector.load %arg10[%c0_39, %c1_40, %c0_41] : memref<2x10x128xbf16, #tpu.memory_space<vmem>>, vector<2x8x128xbf16>
    %c0_42 = arith.constant 0 : index
    %c2_43 = arith.constant 2 : index
    %c0_44 = arith.constant 0 : index
    %48 = vector.load %arg10[%c0_42, %c2_43, %c0_44] : memref<2x10x128xbf16, #tpu.memory_space<vmem>>, vector<2x8x128xbf16>
    %49 = tpu.concatenate %46, %47, %48 in 2 : vector<2x8x128xbf16>, vector<2x8x128xbf16>, vector<2x8x128xbf16> -> vector<2x8x384xbf16>
    %50 = vector.shape_cast %49 : vector<2x8x384xbf16> to vector<16x384xbf16>
    %c0_45 = arith.constant 0 : index
    %c0_46 = arith.constant 0 : index
    %51 = vector.load %arg3[%c0_45, %c0_46] : memref<384x128xbf16, #tpu.memory_space<vmem>>, vector<384x128xbf16>
    %cst_47 = arith.constant dense<0.000000e+00> : vector<16x128xf32>
    %52 = tpu.matmul %50, %51, %cst_47 {dimension_numbers = #tpu.dot_dimension_numbers<[1], [0], [0], [1], [0, 0, 1, 1], [], []>} : vector<16x384xbf16>, vector<384x128xbf16>, vector<16x128xf32> -> vector<16x128xf32>
    %53 = vector.shape_cast %3 : vector<2x8x128xf32> to vector<16x128xf32>
    %54 = arith.addf %53, %52 : vector<16x128xf32>
    %cst_48 = arith.constant dense<0.000000e+00> : vector<128xf32>
    %55 = vector.multi_reduction <add>, %54, %cst_48 [0] : vector<16x128xf32> to vector<128xf32>
    %56 = vector.shape_cast %55 : vector<128xf32> to vector<1x128xf32>
    %57 = arith.mulf %54, %54 : vector<16x128xf32>
    %cst_49 = arith.constant dense<0.000000e+00> : vector<128xf32>
    %58 = vector.multi_reduction <add>, %57, %cst_49 [0] : vector<16x128xf32> to vector<128xf32>
    %59 = vector.shape_cast %58 : vector<128xf32> to vector<1x128xf32>
    %60 = tpu.concatenate %56, %59 in 0 : vector<1x128xf32>, vector<1x128xf32> -> vector<2x128xf32>
    %cst_50 = arith.constant 6.250000e-02 : f32
    %61 = vector.broadcast %cst_50 : f32 to vector<2x128xf32>
    %62 = arith.mulf %60, %61 : vector<2x128xf32>
    %c0_51 = arith.constant 0 : index
    %c0_52 = arith.constant 0 : index
    %63 = vector.load %arg8[%c0_51, %c0_52] : memref<128x128xf32, #tpu.memory_space<vmem>>, vector<128x128xf32>
    %cst_53 = arith.constant dense<0.000000e+00> : vector<2x128xf32>
    %64 = tpu.matmul %62, %63, %cst_53 {dimension_numbers = #tpu.dot_dimension_numbers<[1], [0], [0], [1], [0, 0, 1, 1], [], []>} : vector<2x128xf32>, vector<128x128xf32>, vector<2x128xf32> -> vector<2x128xf32>
    %65 = vector.extract_strided_slice %64 {offsets = [0, 0], sizes = [1, 128], strides = [1, 1]} : vector<2x128xf32> to vector<1x128xf32>
    %66 = vector.extract_strided_slice %64 {offsets = [1, 0], sizes = [1, 128], strides = [1, 1]} : vector<2x128xf32> to vector<1x128xf32>
    %67 = arith.mulf %65, %65 : vector<1x128xf32>
    %68 = arith.subf %66, %67 : vector<1x128xf32>
    %cst_54 = arith.constant 0.000000e+00 : f32
    %69 = vector.broadcast %cst_54 : f32 to vector<1x128xf32>
    %70 = arith.maximumf %68, %69 : vector<1x128xf32>
    %cst_55 = arith.constant 9.99999974E-6 : f32
    %71 = vector.broadcast %cst_55 : f32 to vector<1x128xf32>
    %72 = arith.addf %70, %71 : vector<1x128xf32>
    %73 = math.rsqrt %72 : vector<1x128xf32>
    %74 = vector.broadcast %65 : vector<1x128xf32> to vector<16x128xf32>
    %75 = arith.subf %54, %74 : vector<16x128xf32>
    %c0_56 = arith.constant 0 : index
    %c0_57 = arith.constant 0 : index
    %76 = vector.load %arg6[%c0_56, %c0_57] : memref<1x128xf32, #tpu.memory_space<vmem>>, vector<1x128xf32>
    %77 = arith.mulf %73, %76 : vector<1x128xf32>
    %78 = vector.broadcast %77 : vector<1x128xf32> to vector<16x128xf32>
    %79 = arith.mulf %75, %78 : vector<16x128xf32>
    %c0_58 = arith.constant 0 : index
    %c0_59 = arith.constant 0 : index
    %80 = vector.load %arg7[%c0_58, %c0_59] : memref<1x128xf32, #tpu.memory_space<vmem>>, vector<1x128xf32>
    %81 = vector.broadcast %80 : vector<1x128xf32> to vector<16x128xf32>
    %82 = arith.addf %79, %81 : vector<16x128xf32>
    %cst_60 = arith.constant 0.000000e+00 : f32
    %83 = vector.broadcast %cst_60 : f32 to vector<16x128xf32>
    %84 = arith.maximumf %82, %83 : vector<16x128xf32>
    %85 = vector.shape_cast %84 : vector<16x128xf32> to vector<2x8x128xf32>
    %c0_61 = arith.constant 0 : index
    %c0_62 = arith.constant 0 : index
    %c0_63 = arith.constant 0 : index
    %86 = vector.load %arg9[%c0_61, %c0_62, %c0_63] : memref<2x8x128xf32, #tpu.memory_space<vmem>>, vector<2x8x128xf32>
    tpu.vector_store %arg9[%c0_61, %c0_62, %c0_63], %85 {strides = array<i32>} : memref<2x8x128xf32, #tpu.memory_space<vmem>>, vector<2x8x128xf32>,
    return
  }
  func.func @transform_0(%arg0: i32) -> (i32, i32, i32) {
    %c0_i32 = arith.constant 0 : i32
    %c0_i32_0 = arith.constant 0 : i32
    %c0_i32_1 = arith.constant 0 : i32
    %c0_i32_2 = arith.constant 0 : i32
    return %c0_i32, %c0_i32_0, %c0_i32_1 : i32, i32, i32
  }
  func.func @transform_1(%arg0: i32) -> (i32, i32) {
    %c0_i32 = arith.constant 0 : i32
    %c0_i32_0 = arith.constant 0 : i32
    %c0_i32_1 = arith.constant 0 : i32
    return %c0_i32, %c0_i32_0 : i32, i32
  }
  func.func @transform_2(%arg0: i32) -> (i32, i32) {
    %c0_i32 = arith.constant 0 : i32
    %c0_i32_0 = arith.constant 0 : i32
    %c0_i32_1 = arith.constant 0 : i32
    return %c0_i32, %c0_i32_0 : i32, i32
  }
  func.func @transform_3(%arg0: i32) -> (i32, i32) {
    %c0_i32 = arith.constant 0 : i32
    %c0_i32_0 = arith.constant 0 : i32
    %c0_i32_1 = arith.constant 0 : i32
    return %c0_i32, %c0_i32_0 : i32, i32
  }
  func.func @transform_4(%arg0: i32) -> (i32, i32) {
    %c0_i32 = arith.constant 0 : i32
    %c0_i32_0 = arith.constant 0 : i32
    %c0_i32_1 = arith.constant 0 : i32
    return %c0_i32, %c0_i32_0 : i32, i32
  }
  func.func @transform_5(%arg0: i32) -> (i32, i32) {
    %c0_i32 = arith.constant 0 : i32
    %c0_i32_0 = arith.constant 0 : i32
    %c0_i32_1 = arith.constant 0 : i32
    return %c0_i32, %c0_i32_0 : i32, i32
  }
  func.func @transform_6(%arg0: i32) -> (i32, i32) {
    %c0_i32 = arith.constant 0 : i32
    %c0_i32_0 = arith.constant 0 : i32
    %c0_i32_1 = arith.constant 0 : i32
    return %c0_i32, %c0_i32_0 : i32, i32
  }
  func.func @transform_7(%arg0: i32) -> (i32, i32) {
    %c0_i32 = arith.constant 0 : i32
    %c0_i32_0 = arith.constant 0 : i32
    %c0_i32_1 = arith.constant 0 : i32
    return %c0_i32, %c0_i32_0 : i32, i32
  }
  func.func @transform_8(%arg0: i32) -> (i32, i32, i32) {
    %c0_i32 = arith.constant 0 : i32
    %c0_i32_0 = arith.constant 0 : i32
    %c0_i32_1 = arith.constant 0 : i32
    %c0_i32_2 = arith.constant 0 : i32
    return %c0_i32, %c0_i32_0, %c0_i32_1 : i32, i32, i32
  }
}

</mosaic_0001>

<bundles_post_ra>
// kernel: tpu_custom_call.1
= control target key start
LH: loop header
LB: loop body
LE: loop exit
PB: predicated region body
PF: predicated region fallthrough
CT: control target
= control target key end

     0   :  { %13 = vsyncpa [#allocation4], 0  ;;  %s1965_s0 = inlined_call_operand.hbm [shape: f32[2,8,128], index: 0, kind: input, shape index: {}]   ;;  %s1966_s1 = inlined_call_operand.hbm [shape: bf16[384,128], index: 1, kind: input, shape index: {}]   ;;  %s1967_s2 = inlined_call_operand.hbm [shape: bf16[384,128], index: 2, kind: input, shape index: {}]   ;;  %s1968_s3 = inlined_call_operand.vmem [shape: f32[1,128], index: 3, kind: input, shape index: {}]   ;;  %s1969_s4 = inlined_call_operand.vmem [shape: f32[1,128], index: 4, kind: input, shape index: {}]   ;;  %s1970_s5 = inlined_call_operand.vmem [shape: f32[1,128], index: 5, kind: input, shape index: {}]   ;;  %s1971_s6 = inlined_call_operand.vmem [shape: f32[1,128], index: 6, kind: input, shape index: {}]   ;;  %s1972_s7 = inlined_call_operand.hbm [shape: f32[128,128], index: 7, kind: input, shape index: {}]   ;;  %s1973_s8 = inlined_call_operand.hbm [shape: f32[2,8,128], index: 8, kind: output, shape index: {}]  }
   0x1   :  { %14 = vsyncpa [#allocation7], 0 }
   0x2   :  { %15 = vsyncpa [#allocation10], 0 }
   0x3   :  { %16 = vsyncpa [#allocation5], 0  ;;  %s1660_s27 = smov [#allocation6]   ;;  %s1542_s9 = scalar_lea.hbm %s1966_s1, 3072 }
   0x4   :  { %s34_s28 = sshll.u32 %s1660_s27, 4  ;;  %p1543_p0 = scmp.ne.s32.totalorder %s1966_s1, %s1542_s9  ;;  %s35_s28 = int_to_ptr.vmem [resolvable:$true] %s34_s28 }
   0x5   :  { %p1546_p1 = scmp.lt.u32.totalorder %s1542_s9, %s1966_s1 }
   0x7   :  { %p1548_p2 = pnand %p1546_p1, %p1543_p0 }
   0x9   :  { %1551 = shalt.err (!%p1548_p2)
}
   0xa   :  { %s1552_s14 = scalar_lea.vmem %s35_s28, 3072  ;;  %p1557_p4 = scmp.lt.s32.totalorder %s35_s28, %s35_s28 }
   0xb   :  { %p1553_p3 = scmp.ne.s32.totalorder %s35_s28, %s1552_s14  ;;  %p1558_p5 = scmp.lt.s32.totalorder %s1552_s14, %s1552_s14 }
   0xd   :  { %p1559_p6 = por %p1558_p5, %p1557_p4 }
   0xf   :  { %p1560_p7 = pnand %p1559_p6, %p1553_p3 }
  0x11   :  { %1563 = shalt.err (!%p1560_p7)
}
  0x12   :  { %s1661_s15 = smov 64   ;;  %s1662_s16 = smov 4  }
  0x13   :  { %40 = dma.hbm_to_vmem [thread:$0]  %s1966_s1, 3072, %s35_s28, [#allocation7], %s1661_s15, %s1661_s15, %s1662_s16  }
  0x14   :  { %s1663_s19 = smov [#allocation3]   ;;  %s1564_s23 = scalar_lea.hbm %s1965_s0, 256 }
  0x15   :  { %s22_s20 = sshll.u32 %s1663_s19, 4  ;;  %p1565_p8 = scmp.ne.s32.totalorder %s1965_s0, %s1564_s23  ;;  %s23_s20 = int_to_ptr.vmem [resolvable:$true] %s22_s20 }
  0x16   :  { %p1568_p9 = scmp.lt.u32.totalorder %s1564_s23, %s1965_s0 }
  0x18   :  { %p1570_p10 = pnand %p1568_p9, %p1565_p8 }
  0x1a   :  { %1573 = shalt.err (!%p1570_p10)
}
  0x1b   :  { %s1574_s29 = scalar_lea.vmem %s23_s20, 256  ;;  %p1579_p12 = scmp.lt.s32.totalorder %s23_s20, %s23_s20 }
  0x1c   :  { %p1575_p11 = scmp.ne.s32.totalorder %s23_s20, %s1574_s29  ;;  %p1580_p13 = scmp.lt.s32.totalorder %s1574_s29, %s1574_s29 }
  0x1e   :  { %p1581_p0 = por %p1580_p13, %p1579_p12 }
  0x20   :  { %p1582_p1 = pnand %p1581_p0, %p1575_p11 }
  0x22   :  { %1585 = shalt.err (!%p1582_p1)
}
  0x23   :  { %s1664_s1 = smov 128   ;;  %s1665_s28 = smov 8  }
  0x24   :  { %28 = dma.hbm_to_vmem [thread:$0]  %s1965_s0, 256, %s23_s20, [#allocation4], %s1664_s1, %s1664_s1, %s1665_s28  }
  0x25   :  { %s1666_s10 = smov [#allocation8]   ;;  %s1667_s12 = smov [#allocation9]  }
  0x26   :  { %s46_s11 = sshll.u32 %s1666_s10, 4  ;;  %s66_s13 = sshll.u32 %s1667_s12, 4  ;;  %s47_s11 = int_to_ptr.vmem [resolvable:$true] %s46_s11  ;;  %s1747_s13 = int_to_ptr.vmem [resolvable:$true] %s66_s13 }
  0x27   :  { %s1586_s18 = scalar_lea.hbm %s1967_s2, 3072 }
  0x28   :  { %p1587_p2 = scmp.ne.s32.totalorder %s1967_s2, %s1586_s18  ;;  %p1590_p3 = scmp.lt.u32.totalorder %s1586_s18, %s1967_s2 }
  0x2a   :  { %p1592_p4 = pnand %p1590_p3, %p1587_p2 }
  0x2c   :  { %1595 = shalt.err (!%p1592_p4)
}
  0x2d   :  { %s1596_s0 = scalar_lea.vmem %s47_s11, 3072  ;;  %p1601_p6 = scmp.lt.s32.totalorder %s47_s11, %s47_s11 }
  0x2e   :  { %p1597_p5 = scmp.ne.s32.totalorder %s47_s11, %s1596_s0  ;;  %p1602_p7 = scmp.lt.s32.totalorder %s1596_s0, %s1596_s0 }
  0x30   :  { %p1603_p8 = por %p1602_p7, %p1601_p6 }
  0x32   :  { %p1604_p9 = pnand %p1603_p8, %p1597_p5 }
  0x34   :  { %1607 = shalt.err (!%p1604_p9)
}
  0x35   :  { %52 = dma.hbm_to_vmem [thread:$0]  %s1967_s2, 3072, %s47_s11, [#allocation7], %s1661_s15, %s1661_s15, %s1662_s16  }
  0x36   :  { %s1608_s27 = scalar_lea.hbm %s1972_s7, 2048 }
  0x37   :  { %p1609_p10 = scmp.ne.s32.totalorder %s1972_s7, %s1608_s27  ;;  %p1612_p11 = scmp.lt.u32.totalorder %s1608_s27, %s1972_s7 }
  0x39   :  { %p1614_p12 = pnand %p1612_p11, %p1609_p10 }
  0x3b   :  { %1617 = shalt.err (!%p1614_p12)
}
  0x3c   :  { %s1618_s12 = scalar_lea.vmem %s1747_s13, 2048  ;;  %p1623_p0 = scmp.lt.s32.totalorder %s1747_s13, %s1747_s13 }
  0x3d   :  { %p1619_p13 = scmp.ne.s32.totalorder %s1747_s13, %s1618_s12  ;;  %p1624_p1 = scmp.lt.s32.totalorder %s1618_s12, %s1618_s12 }
  0x3f   :  { %p1625_p2 = por %p1624_p1, %p1623_p0 }
  0x41   :  { %p1626_p3 = pnand %p1625_p2, %p1619_p13 }
  0x43   :  { %1629 = shalt.err (!%p1626_p3)
}
  0x44   :  { %72 = dma.hbm_to_vmem [thread:$0]  %s1972_s7, 2048, %s1747_s13, [#allocation10], %s1664_s1, %s1664_s1, %s1665_s28  }
  0x45   :  { %1652 = dma.done.wait [#allocation4], 256  }
  0x46   :  { %1653 = vsyncadd [#allocation4], 4294967040 }
  0x47   :  { %1654 = dma.done.wait [#allocation7], 6144  }
  0x48   :  { %1655 = vsyncadd [#allocation7], 4294961152 }
  0x49   :  { %1656 = dma.done.wait [#allocation10], 2048  }
  0x4a   :  { %1657 = vsyncadd [#allocation10], 4294965248  ;;  %v1668_v0 = vmov 0.0   ;;  %vm1669_vm0 = vmmov 0   ;;  %v1480_v1 = vld [vmem:[#allocation6 + $0x40] sm:$0xff]   ;;  %v1483_v4 = vld [vmem:[#allocation6 + $0x48] sm:$0xff]  }
  0x4b   :  { %1310 = vmatprep.subr.bf16.mxu1 %v1668_v0  ;;  %1326 = vmatprep.mubr.msk.bf16.mxu1 %vm1669_vm0, %v1668_v0  ;;  %v1481_v2 = vld [vmem:[#allocation6] sm:$0xff]   ;;  %vm87_vm1 = vsmask.f32 256  ;;  %v1484_v5 = vld [vmem:[#allocation6 + $0x8] sm:$0xff]   ;;  %v1486_v7 = vld [vmem:[#allocation6 + $0x50] sm:$0xff]   ;;  %vm86_vm2 = vcmask 1040384  }
  0x4c   :  { %1214 = vmatprep.subr.bf16.mxu0 %v1480_v1  ;;  %v1482_v3 = vld [vmem:[#allocation6 + $0x80] sm:$0xff]   ;;  %v1485_v6 = vld [vmem:[#allocation6 + $0x88] sm:$0xff]   ;;  %v1487_v8 = vld [vmem:[#allocation6 + $0x10] sm:$0xff]   ;;  %vm95_vm3 = vsmask.f32 7938  ;;  %vm133_vm6 = vcmask 1043456  }
  0x4d   :  { %1215 = vmatpush3.bf16.msra.mxu0 %v1481_v2  ;;  %1311 = vmatpush3.bf16.msra.mxu1 %v1482_v3  ;;  %v1488_v9 = vld [vmem:[#allocation6 + $0x90] sm:$0xff]   ;;  %v1489_v10 = vld [vmem:[#allocation6 + $0x58] sm:$0xff]   ;;  %v1492_v13 = vld [vmem:[#allocation6 + $0x60] sm:$0xff]   ;;  %v1670_v48 = vmov 0.0|0.0   ;;  %s1671_s18 = smov [#allocation11]  }
  0x4e   :  { %1216 = vmatprep.subr.bf16.mxu0 %v1483_v4  ;;  %1312 = vmatprep.subr.bf16.mxu1 %v1668_v0  ;;  %v1490_v11 = vld [vmem:[#allocation6 + $0x18] sm:$0xff]   ;;  %v1493_v14 = vld [vmem:[#allocation6 + $0x20] sm:$0xff]   ;;  %vm1792_vm4 = vmand %vm86_vm2, %vm87_vm1  ;;  %s1126_s19 = sshll.u32 %s1671_s18, 4  ;;  %s1127_s19 = int_to_ptr.vmem [resolvable:$true] %s1126_s19 }
  0x4f   :  { %v1491_v12 = vld [vmem:[#allocation6 + $0x98] sm:$0xff]   ;;  %v1494_v16 = vld [vmem:[#allocation6 + $0xa0] sm:$0xff]   ;;  %v1495_v17 = vld [vmem:[#allocation6 + $0x68] sm:$0xff]   ;;  %p1635_p5 = scmp.lt.s32.totalorder %s1127_s19, %s1127_s19 }
  0x50   :  { %vm1799_vm5 = vmand %vm86_vm2, %vm95_vm3  ;;  %v1496_v19 = vld [vmem:[#allocation6 + $0x28] sm:$0xff]   ;;  %v1498_v21 = vld [vmem:[#allocation6 + $0x70] sm:$0xff]  }
  0x51   :  { %1217 = vmatpush3.bf16.msra.mxu0 %v1484_v5  ;;  %1313 = vmatpush3.bf16.msra.mxu1 %v1485_v6  ;;  %v1497_v20 = vld [vmem:[#allocation6 + $0xa8] sm:$0xff]   ;;  %v1499_v22 = vld [vmem:[#allocation6 + $0x30] sm:$0xff]   ;;  %v1501_v24 = vld [vmem:[#allocation6 + $0x78] sm:$0xff]  }
  0x52   :  { %1218 = vmatprep.subr.bf16.mxu0 %v1486_v7  ;;  %1314 = vmatprep.subr.bf16.mxu1 %v1668_v0  ;;  %v1500_v23 = vld [vmem:[#allocation6 + $0xb0] sm:$0xff]   ;;  %v89_v25 = vld [vmem:[#allocation2] sm:$0x1]  ;;  %v92_v26 = vld [vmem:[#allocation2 + $0x8] sm:$0x1] }
  0x53   :  { %v97_v27 = vld [vmem:[#allocation2 + $0x4] sm:$0x1]  ;;  %v90_v28 = vsel %vm1792_vm4, 0, %v89_v25  ;;  %v93_v29 = vsel %vm1792_vm4, 0, %v92_v26  ;;  %v100_v31 = vld [vmem:[#allocation2 + $0xc] sm:$0x1]  ;;  %vm1823_vm7 = vmand %vm133_vm6, %vm95_vm3 }
  0x54   :  { %v98_v30 = vsel %vm1799_vm5, 0, %v97_v27  ;;  %v1811_v32 = vld [vmem:[#allocation3] sm:$0xff]  ;;  %v1502_v33 = vld [vmem:[#allocation6 + $0x38] sm:$0xff]   ;;  %91 = vst [vmem:[#allocation2] sm:$0x1] %v90_v28  ;;  %v101_v35 = vsel %vm1799_vm5, 0, %v100_v31 }
  0x55   :  { %1219 = vmatpush3.bf16.msra.mxu0 %v1487_v8  ;;  %1315 = vmatpush3.bf16.msra.mxu1 %v1488_v9  ;;  %v1503_v34 = vld [vmem:[#allocation6 + $0xb8] sm:$0xff]   ;;  %94 = vst [vmem:[#allocation2 + $0x8] sm:$0x1] %v93_v29  ;;  %99 = vst [vmem:[#allocation2 + $0x4] sm:$0x1] %v98_v30  ;;  %v1210_v37 = vpack.c.bf16 %v1811_v32, %v1811_v32  ;;  %v492_v26 = vld [vmem:[#allocation9 + $0x20] sm:$0xff] }
  0x56   :  { %1220 = vmatprep.subr.bf16.mxu0 %v1489_v10  ;;  %1316 = vmatprep.subr.bf16.mxu1 %v1668_v0  ;;  %v1815_v36 = vld [vmem:[#allocation3 + $0x8] sm:$0xff]  ;;  %102 = vst [vmem:[#allocation2 + $0xc] sm:$0x1] %v101_v35  ;;  %v493_v27 = vld [vmem:[#allocation9 + $0x28] sm:$0xff]  ;;  %v494_v29 = vld [vmem:[#allocation9 + $0x30] sm:$0xff] }
  0x57   :  { %v1211_v38 = vpack.c.bf16 %v1815_v36, %v1815_v36  ;;  %v114_v39 = vshrl.u32 %v1210_v37, 16  ;;  %v117_v40 = vshll.u32 %v1210_v37, 16  ;;  %v1850_v28 = vpack.c.bf16 %v493_v27, %v492_v26  ;;  %v495_v30 = vld [vmem:[#allocation9 + $0x38] sm:$0xff]  ;;  %v498_v37 = vld [vmem:[#allocation9 + $0x50] sm:$0xff] }
  0x58   :  { %v1854_v31 = vpack.c.bf16 %v495_v30, %v494_v29  ;;  %v1516_v26 = vld [vmem:[#allocation8 + $0x50] sm:$0xff]   ;;  %v1517_v27 = vld [vmem:[#allocation8 + $0x98] sm:$0xff]  }
  0x59   :  { %1221 = vmatpush3.bf16.msra.mxu0 %v1490_v11  ;;  %1317 = vmatpush3.bf16.msra.mxu1 %v1491_v12  ;;  %v122_v41 = vshrl.u32 %v1211_v38, 16  ;;  %v125_v42 = vshll.u32 %v1211_v38, 16  ;;  %v116_v43 = vrot.slane %v114_v39, 7  ;;  %v499_v38 = vld [vmem:[#allocation9 + $0x58] sm:$0xff]  ;;  %v1518_v29 = vld [vmem:[#allocation8 + $0x10] sm:$0xff]  }
  0x5a   :  { %1222 = vmatprep.subr.bf16.mxu0 %v1492_v13  ;;  %1318 = vmatprep.subr.bf16.mxu1 %v1668_v0  ;;  %v488_v13 = vld [vmem:[#allocation9] sm:$0xff]  ;;  %v1862_v39 = vpack.c.bf16 %v499_v38, %v498_v37  ;;  %v1519_v30 = vld [vmem:[#allocation8 + $0x58] sm:$0xff]   ;;  %v1523_v38 = vld [vmem:[#allocation8 + $0xa8] sm:$0xff]  }
  0x5b   :  { %v124_v44 = vrot.slane %v122_v41, 7  ;;  %v119_v46 = vor.u32 %v117_v40, %v116_v43  ;;  %v120_v47 = vrot.slane %v116_v43, 4  ;;  %v135_v51 = vld [vmem:[#allocation2] sm:$0xf]  ;;  %v501_v41 = vld [vmem:[#allocation9 + $0x68] sm:$0xff]  ;;  %v502_v43 = vld [vmem:[#allocation9 + $0x70] sm:$0xff] }
  0x5c   :  { %v138_v52 = vld [vmem:[#allocation2 + $0x4] sm:$0x1]  ;;  %v141_v55 = vld [vmem:[#allocation2 + $0x8] sm:$0xf] }
  0x5d   :  { %1223 = vmatpush3.bf16.msra.mxu0 %v1493_v14  ;;  %1319 = vmatpush3.bf16.msra.mxu1 %v1494_v16  ;;  %v127_v49 = vor.u32 %v125_v42, %v124_v44  ;;  %v128_v50 = vrot.slane %v124_v44, 4  ;;  %v136_v53 = vsel %vm1823_vm7, %v119_v46, %v135_v51  ;;  %v139_v54 = vsel %vm1792_vm4, %v120_v47, %v138_v52  ;;  %v144_v56 = vld [vmem:[#allocation2 + $0xc] sm:$0x1]  ;;  %v500_v40 = vld [vmem:[#allocation9 + $0x60] sm:$0xff]  ;;  %v503_v44 = vld [vmem:[#allocation9 + $0x78] sm:$0xff] }
  0x5e   :  { %1224 = vmatprep.subr.bf16.mxu0 %v1495_v17  ;;  %1320 = vmatprep.subr.bf16.mxu1 %v1668_v0  ;;  %137 = vst [vmem:[#allocation2] sm:$0xf] %v136_v53  ;;  %140 = vst [vmem:[#allocation2 + $0x4] sm:$0x1] %v139_v54  ;;  %v489_v17 = vld [vmem:[#allocation9 + $0x8] sm:$0xff]  ;;  %v1866_v42 = vpack.c.bf16 %v501_v41, %v500_v40  ;;  %v1869_v46 = vpack.c.bf16 %v503_v44, %v502_v43  ;;  %v1522_v37 = vld [vmem:[#allocation8 + $0x60] sm:$0xff]  }
  0x5f   :  { %v142_v57 = vsel %vm1823_vm7, %v127_v49, %v141_v55  ;;  %v145_v58 = vsel %vm1792_vm4, %v128_v50, %v144_v56  ;;  %v1524_v40 = vld [vmem:[#allocation8 + $0x20] sm:$0xff]   ;;  %v1525_v41 = vld [vmem:[#allocation8 + $0x68] sm:$0xff]   ;;  %v1526_v43 = vld [vmem:[#allocation8 + $0xb0] sm:$0xff]  }
  0x60   :  { %143 = vst [vmem:[#allocation2 + $0x8] sm:$0xf] %v142_v57  ;;  %146 = vst [vmem:[#allocation2 + $0xc] sm:$0x1] %v145_v58  ;;  %v1527_v44 = vld [vmem:[#allocation8 + $0x28] sm:$0xff]  }
  0x61   :  { %1225 = vmatpush3.bf16.msra.mxu0 %v1496_v19  ;;  %1321 = vmatpush3.bf16.msra.mxu1 %v1497_v20 }
  0x62   :  { %1226 = vmatprep.subr.bf16.mxu0 %v1498_v21  ;;  %1322 = vmatprep.subr.bf16.mxu1 %v1668_v0 }
  0x65   :  { %1227 = vmatpush3.bf16.msra.mxu0 %v1499_v22  ;;  %1323 = vmatpush3.bf16.msra.mxu1 %v1500_v23  ;;  %v1836_v59 = vld [vmem:[#allocation2] sm:$0xf]  ;;  %v149_v60 = vld [vmem:[#allocation2 + $0x4] sm:$0x1]  ;;  %v1840_v22 = vpack.c.bf16 %v489_v17, %v488_v13  ;;  %v490_v23 = vld [vmem:[#allocation9 + $0x10] sm:$0xff] }
  0x66   :  { %1228 = vmatprep.subr.bf16.mxu0 %v1501_v24  ;;  %1324 = vmatprep.subr.bf16.mxu1 %v1668_v0  ;;  %v151_v61 = vld [vmem:[#allocation2] sm:$0xe]  ;;  %v1142_v1 = vcombine.low %v1836_v59, %v149_v60  ;;  %v491_v24 = vld [vmem:[#allocation9 + $0x18] sm:$0xff] }
  0x67   :  { %v148_v62 = vld [vmem:[#allocation2 + $0x8] sm:$0xf]  ;;  %v150_v63 = vld [vmem:[#allocation2 + $0xc] sm:$0x1]  ;;  %v1144_v3 = vcombine.low %v151_v61, %v149_v60  ;;  %v1846_v25 = vpack.c.bf16 %v491_v24, %v490_v23  ;;  %v1509_v17 = vld [vmem:[#allocation8 + $0x80] sm:$0xff]  }
  0x68   :  { %v152_v2 = vld [vmem:[#allocation2 + $0x8] sm:$0xe]  ;;  %v1143_v4 = vcombine.low %v148_v62, %v150_v63  ;;  %v164_v6 = vshrl.u32 %v1142_v1, 16  ;;  %v166_v7 = vshll.u32 %v1142_v1, 16  ;;  %v1146_v20 = vcombine.low %v1836_v59, %v148_v62  ;;  %v1514_v23 = vld [vmem:[#allocation8 + $0x90] sm:$0xff]  }
  0x69   :  { %1229 = vmatpush3.bf16.msra.mxu0 %v1502_v33  ;;  %1325 = vmatpush3.bf16.msra.mxu1 %v1503_v34  ;;  %v1145_v5 = vcombine.low %v152_v2, %v150_v63  ;;  %v183_v8 = vrot.slane %v1144_v3, 1  ;;  %v496_v33 = vld [vmem:[#allocation9 + $0x40] sm:$0xff]  ;;  %v497_v34 = vld [vmem:[#allocation9 + $0x48] sm:$0xff] }
  0x6a   :  { %1420 = vmatprep.subr.bf16.mxu0 %v1670_v48  ;;  %v171_v9 = vshrl.u32 %v1143_v4, 16  ;;  %v173_v10 = vshll.u32 %v1143_v4, 16  ;;  %v168_v12 = vrot.slane %v166_v7, 1  ;;  %v1858_v35 = vpack.c.bf16 %v497_v34, %v496_v33  ;;  %v1515_v24 = vld [vmem:[#allocation8 + $0x8] sm:$0xff]   ;;  %v1520_v33 = vld [vmem:[#allocation8 + $0xa0] sm:$0xff]   ;;  %v1521_v34 = vld [vmem:[#allocation8 + $0x18] sm:$0xff]  }
  0x6b   :  { %v184_v11 = vrot.slane %v1145_v5, 1 }
  0x6c   :  { %v175_v14 = vrot.slane %v173_v10, 1  ;;  %v169_v18 = vor.u32 %v168_v12, %v164_v6 }
  0x6d   :  { %v1148_v16 = vcombine.low %v183_v8, %v184_v11 }
  0x6e   :  { %v176_v19 = vor.u32 %v175_v14, %v171_v9 }
  0x6f   :  { %1327 = vmatmul.mubr.bf16.vlgmr.msra.gmra.mrb[0].mxu1 %v1148_v16 }
  0x70   :  { %v1147_v21 = vcombine.low %v169_v18, %v176_v19  ;;  %v1510_v18 = vld [vmem:[#allocation8 + $0x40] sm:$0xff]   ;;  %v1511_v19 = vld [vmem:[#allocation8 + $0x88] sm:$0xff]  }
  0x71   :  { %1262 = vmatprep.subr.bf16.mxu1 %v1510_v18 }
  0x72   :  { %419 = vmatprep.mubr.bf16.mxu0 %v1147_v21  ;;  %v1513_v21 = vld [vmem:[#allocation8 + $0x48] sm:$0xff]  }
  0x73   :  { %420 = vmatmul.mubr.bf16.vlgmr.msra.gmra.mrb[0].mxu0 %v1146_v20  ;;  %v1512_v20 = vld [vmem:[#allocation8] sm:$0xff]  }
  0x74   :  { %1422 = vmatpush3.bf16.msra.mxu0 %v1840_v22  ;;  %1362 = vmatprep.mubr.msk.f32.mxu0 %vm1669_vm0, %v1668_v0 }
  0x75   :  { %1423 = vmatprep.subr.bf16.mxu0 %v1670_v48  ;;  %1263 = vmatpush3.bf16.msra.mxu1 %v1512_v20 }
  0x76   :  { %1264 = vmatprep.subr.bf16.mxu1 %v1513_v21 }
  0x78   :  { %1425 = vmatpush3.bf16.msra.mxu0 %v1846_v25 }
  0x79   :  { %1426 = vmatprep.subr.bf16.mxu0 %v1670_v48  ;;  %1265 = vmatpush3.bf16.msra.mxu1 %v1515_v24 }
  0x7a   :  { %1266 = vmatprep.subr.bf16.mxu1 %v1516_v26 }
  0x7c   :  { %1428 = vmatpush3.bf16.msra.mxu0 %v1850_v28 }
  0x7d   :  { %1429 = vmatprep.subr.bf16.mxu0 %v1670_v48  ;;  %1267 = vmatpush3.bf16.msra.mxu1 %v1518_v29  ;;  %v646_v29 = vld [vmem:[#allocation2 + $0x8] sm:$0xf] }
  0x7e   :  { %1268 = vmatprep.subr.bf16.mxu1 %v1519_v30  ;;  %v649_v30 = vld [vmem:[#allocation2 + $0xc] sm:$0x1] }
  0x80   :  { %1431 = vmatpush3.bf16.msra.mxu0 %v1854_v31 }
  0x81   :  { %1432 = vmatprep.subr.bf16.mxu0 %v1670_v48  ;;  %1269 = vmatpush3.bf16.msra.mxu1 %v1521_v34 }
  0x82   :  { %1270 = vmatprep.subr.bf16.mxu1 %v1522_v37 }
  0x84   :  { %1434 = vmatpush3.bf16.msra.mxu0 %v1858_v35 }
  0x85   :  { %1435 = vmatprep.subr.bf16.mxu0 %v1670_v48  ;;  %1271 = vmatpush3.bf16.msra.mxu1 %v1524_v40 }
  0x86   :  { %1272 = vmatprep.subr.bf16.mxu1 %v1525_v41 }
  0x88   :  { %1437 = vmatpush3.bf16.msra.mxu0 %v1862_v39 }
  0x89   :  { %1438 = vmatprep.subr.bf16.mxu0 %v1670_v48  ;;  %1273 = vmatpush3.bf16.msra.mxu1 %v1527_v44 }
  0x8c   :  { %1440 = vmatpush3.bf16.msra.mxu0 %v1866_v42 }
  0x8d   :  { %1441 = vmatprep.subr.bf16.mxu0 %v1670_v48 }
  0x90   :  { %1443 = vmatpush3.bf16.msra.mxu0 %v1869_v46 }
  0x91   :  { %1365 = vmatprep.subr.bf16.mxu0 %v1668_v0 }
 0x142   :  { %v462_v47 = vpop.f32.mrb[0].mxu1 }
 0x143   :  { %v1328_v49 = vpop.f32.mrb[1].mxu1 }
 0x144   :  { %v465_v50 = vpop.f32.mrb[2].mxu1  ;;  %v1529_v49 = vld [vmem:[#allocation8 + $0xb8] sm:$0xff]  }
 0x145   :  { %v1329_v51 = vpop.f32.mrb[3].mxu1 }
 0x146   :  { %v1230_v52 = vpop.f32.mrb[0].mxu0  ;;  %v1533_v51 = vld [vmem:[#allocation8 + $0x78] sm:$0xff]  }
 0x147   :  { %v1231_v53 = vpop.f32.mrb[1].mxu0 }
 0x148   :  { %v1232_v54 = vadd.f32 %v1231_v53, %v1230_v52  ;;  %v1233_v55 = vpop.f32.mrb[2].mxu0  ;;  %v1534_v52 = vld [vmem:[#allocation8 + $0x38] sm:$0xff]  }
 0x149   :  { %v1234_v56 = vpop.f32.mrb[3].mxu0 }
 0x14a   :  { %v1874_v57 = vadd.f32 %v1232_v54, %v462_v47  ;;  %v1235_v58 = vadd.f32 %v1234_v56, %v1233_v55  ;;  %v1528_v47 = vld [vmem:[#allocation8 + $0x70] sm:$0xff]  }
 0x14b   :  { %1274 = vmatprep.subr.bf16.mxu1 %v1528_v47 }
 0x14c   :  { %v1876_v60 = vadd.f32 %v1235_v58, %v465_v50  ;;  %v476_v61 = vmul.f32 %v1874_v57, %v1874_v57  ;;  %v1530_v50 = vld [vmem:[#allocation8 + $0x30] sm:$0xff]  }
 0x14d   :  { %1275 = vmatpush3.bf16.msra.mxu1 %v1530_v50 }
 0x14e   :  { %v469_v62 = vadd.f32 %v1876_v60, %v1874_v57  ;;  %v477_v63 = vmul.f32 %v1876_v60, %v1876_v60  ;;  %1276 = vmatprep.subr.bf16.mxu1 %v1533_v51 }
 0x150   :  { %v470_v1 = vrot.slane %v469_v62, 4  ;;  %v478_v2 = vadd.f32 %v477_v63, %v476_v61 }
 0x151   :  { %1277 = vmatpush3.bf16.msra.mxu1 %v1534_v52 }
 0x152   :  { %v471_v3 = vadd.f32 %v470_v1, %v469_v62  ;;  %v479_v4 = vrot.slane %v478_v2, 4  ;;  %1444 = vmatprep.subr.bf16.mxu1 %v1670_v48  ;;  %v582_v62 = vlaneseq }
 0x154   :  { %v472_v5 = vrot.slane %v471_v3, 2  ;;  %v480_v6 = vadd.f32 %v479_v4, %v478_v2  ;;  %v1895_v1 = vshrl.u32 %v582_v62, 7 }
 0x156   :  { %v473_v7 = vadd.f32 %v472_v5, %v471_v3  ;;  %v481_v8 = vrot.slane %v480_v6, 2  ;;  %v584_v2 = vsub.s32 0, %v1895_v1  ;;  %v1173_v3 = vld [vmem:[%s1968_s3] ss:$0 sm:$0xff]  ;;  %v598_v5 = vsub.s32 1, %v1895_v1 }
 0x158   :  { %v474_v9 = vrot.slane %v473_v7, 1  ;;  %v482_v10 = vadd.f32 %v481_v8, %v480_v6 }
 0x15a   :  { %v483_v11 = vrot.slane %v482_v10, 1  ;;  %v475_v12 = vadd.f32 %v474_v9, %v473_v7 }
 0x15c   :  { %v484_v13 = vadd.f32 %v483_v11, %v482_v10  ;;  %v1174_v11 = vld [vmem:[%s1969_s4] ss:$0 sm:$0xff] }
 0x15e   :  { %v486_v14 = vsel %vm86_vm2, %v475_v12, %v484_v13 }
 0x15f   :  { %v487_v16 = vmul.f32 0.0625, %v486_v14 }
 0x161   :  { %1363 = vmatmul.mubr.f32.vlgmr.msra.gmra.mrb[4].mxu0 %v487_v16 }
 0x162   :  { %1381 = vmatprep.mubr.msk.bf16.mxu0 %vm1669_vm0, %v1668_v0  ;;  %1366 = vmatpush3.bf16.msra.mxu0 %v1509_v17 }
 0x163   :  { %1367 = vmatprep.subr.bf16.mxu0 %v1668_v0 }
 0x166   :  { %1368 = vmatpush3.bf16.msra.mxu0 %v1511_v19 }
 0x167   :  { %1369 = vmatprep.subr.bf16.mxu0 %v1668_v0 }
 0x16a   :  { %1370 = vmatpush3.bf16.msra.mxu0 %v1514_v23 }
 0x16b   :  { %1371 = vmatprep.subr.bf16.mxu0 %v1668_v0 }
 0x16e   :  { %1372 = vmatpush3.bf16.msra.mxu0 %v1517_v27  ;;  %v643_v27 = vld [vmem:[#allocation2 + $0x4] sm:$0x1] }
 0x16f   :  { %1373 = vmatprep.subr.bf16.mxu0 %v1668_v0 }
 0x172   :  { %1374 = vmatpush3.bf16.msra.mxu0 %v1520_v33 }
 0x173   :  { %1375 = vmatprep.subr.bf16.mxu0 %v1668_v0 }
 0x176   :  { %1376 = vmatpush3.bf16.msra.mxu0 %v1523_v38 }
 0x177   :  { %1377 = vmatprep.subr.bf16.mxu0 %v1668_v0 }
 0x17a   :  { %1378 = vmatpush3.bf16.msra.mxu0 %v1526_v43 }
 0x17b   :  { %1379 = vmatprep.subr.bf16.mxu0 %v1668_v0 }
 0x17e   :  { %1380 = vmatpush3.bf16.msra.mxu0 %v1529_v49 }
 0x234   :  { %v570_v53 = vpop.f32.mrb[4].mxu0 }
 0x235   :  { %v574_v54 = vmul.f32 %v570_v53, %v570_v53  ;;  %v1364_v55 = vpop.f32.mrb[5].mxu0  ;;  %v585_v4 = vrot.slane %v570_v53, %v584_v2 }
 0x237   :  { %v576_v56 = vrot.slane %v574_v54, 7  ;;  %v586_v8 = vsub.f32 %v1874_v57, %v585_v4  ;;  %v587_v9 = vsub.f32 %v1876_v60, %v585_v4 }
 0x239   :  { %v578_v58 = vsub.f32 %v570_v53, %v576_v56 }
 0x23b   :  { %v579_v61 = vmax.f32 %v578_v58, 0.0 }
 0x23d   :  { %v580_v63 = vadd.f32 1e-05, %v579_v61 }
 0x23f   :  { %1538 = vrsqrt.f32 %v580_v63 }
 0x249   :  { %v1539_v6 = vpop.eup %1538 }
 0x24a   :  { %v595_v7 = vmul.f32 %v1539_v6, %v1173_v3 }
 0x24c   :  { %v599_v10 = vrot.slane %v595_v7, %v598_v5 }
 0x24e   :  { %v600_v12 = vmul.f32 %v599_v10, %v586_v8  ;;  %v601_v13 = vmul.f32 %v599_v10, %v587_v9 }
 0x250   :  { %v609_v14 = vadd.f32 %v1174_v11, %v600_v12  ;;  %v610_v16 = vadd.f32 %v1174_v11, %v601_v13 }
 0x252   :  { %v611_v17 = vmax.f32 %v609_v14, 0.0  ;;  %v612_v18 = vmax.f32 %v610_v16, 0.0 }
 0x254   :  { %v1212_v19 = vpack.c.bf16 %v611_v17, %v611_v17  ;;  %v1213_v20 = vpack.c.bf16 %v612_v18, %v612_v18 }
 0x256   :  { %v622_v21 = vshrl.u32 %v1212_v19, 16  ;;  %v630_v23 = vshrl.u32 %v1213_v20, 16  ;;  %v625_v24 = vshll.u32 %v1212_v19, 16  ;;  %v633_v26 = vshll.u32 %v1213_v20, 16 }
 0x258   :  { %v624_v57 = vrot.slane %v622_v21, 7  ;;  %v632_v60 = vrot.slane %v630_v23, 7 }
 0x25a   :  { %v627_v33 = vor.u32 %v625_v24, %v624_v57  ;;  %v628_v34 = vrot.slane %v624_v57, 4  ;;  %v635_v37 = vor.u32 %v633_v26, %v632_v60  ;;  %v636_v38 = vrot.slane %v632_v60, 4 }
 0x25c   :  { %v641_v40 = vsel %vm1823_vm7, %v627_v33, %v1836_v59  ;;  %v644_v41 = vsel %vm1792_vm4, %v628_v34, %v643_v27  ;;  %v647_v43 = vsel %vm1823_vm7, %v635_v37, %v646_v29  ;;  %v650_v44 = vsel %vm1792_vm4, %v636_v38, %v649_v30 }
 0x25d   :  { %642 = vst [vmem:[#allocation2] sm:$0xf] %v641_v40  ;;  %645 = vst [vmem:[#allocation2 + $0x4] sm:$0x1] %v644_v41 }
 0x25e   :  { %648 = vst [vmem:[#allocation2 + $0x8] sm:$0xf] %v647_v43  ;;  %651 = vst [vmem:[#allocation2 + $0xc] sm:$0x1] %v650_v44 }
 0x264   :  { %v654_v47 = vld [vmem:[#allocation2 + $0x4] sm:$0x1]  ;;  %v656_v50 = vld [vmem:[#allocation2] sm:$0xe] }
 0x265   :  { %v655_v49 = vld [vmem:[#allocation2 + $0xc] sm:$0x1]  ;;  %v657_v51 = vld [vmem:[#allocation2 + $0x8] sm:$0xe]  ;;  %v1179_v52 = vcombine.low %v656_v50, %v654_v47  ;;  %v652_v53 = vld [vmem:[#allocation2] sm:$0xf] }
 0x266   :  { %v653_v59 = vld [vmem:[#allocation2 + $0x8] sm:$0xf]  ;;  %v1180_v54 = vcombine.low %v657_v51, %v655_v49  ;;  %v1177_v55 = vcombine.low %v652_v53, %v654_v47 }
 0x267   :  { %v1178_v56 = vcombine.low %v653_v59, %v655_v49  ;;  %v688_v58 = vrot.slane %v1179_v52, 1  ;;  %v1181_v10 = vcombine.low %v652_v53, %v653_v59  ;;  %v1208_v49 = vld [vmem:[%s1970_s5] ss:$0 sm:$0xff]  ;;  %s1630_s5 = scalar_lea.vmem %s1127_s19, 256 }
 0x268   :  { %v689_v45 = vrot.slane %v1180_v54, 1  ;;  %v671_v61 = vshll.u32 %v1177_v55, 16  ;;  %v669_v63 = vshrl.u32 %v1177_v55, 16  ;;  %v1209_v55 = vld [vmem:[%s1971_s6] ss:$0 sm:$0xff]  ;;  %p1631_p4 = scmp.ne.s32.totalorder %s1127_s19, %s1630_s5  ;;  %p1636_p6 = scmp.lt.s32.totalorder %s1630_s5, %s1630_s5 }
 0x269   :  { %v678_v62 = vshll.u32 %v1178_v56, 16  ;;  %v676_v4 = vshrl.u32 %v1178_v56, 16 }
 0x26a   :  { %v1183_v15 = vcombine.low %v688_v58, %v689_v45  ;;  %v673_v3 = vrot.slane %v671_v61, 1  ;;  %p1637_p7 = por %p1636_p6, %p1635_p5 }
 0x26b   :  { %v680_v6 = vrot.slane %v678_v62, 1 }
 0x26c   :  { %1382 = vmatmul.mubr.bf16.vlgmr.msra.gmra.mrb[8].mxu0 %v1183_v15  ;;  %v674_v7 = vor.u32 %v673_v3, %v669_v63  ;;  %p1638_p8 = pnand %p1637_p7, %p1631_p4 }
 0x26d   :  { %v681_v8 = vor.u32 %v680_v6, %v676_v4 }
 0x26f   :  { %v1182_v9 = vcombine.low %v674_v7, %v681_v8 }
 0x271   :  { %924 = vmatprep.mubr.bf16.mxu1 %v1182_v9 }
 0x272   :  { %925 = vmatmul.mubr.bf16.vlgmr.msra.gmra.mrb[4].mxu1 %v1181_v10 }
 0x273   :  { %1446 = vmatpush3.bf16.msra.mxu1 %v1840_v22  ;;  %1417 = vmatprep.mubr.msk.f32.mxu1 %vm1669_vm0, %v1668_v0 }
 0x274   :  { %1447 = vmatprep.subr.bf16.mxu1 %v1670_v48 }
 0x277   :  { %1449 = vmatpush3.bf16.msra.mxu1 %v1846_v25 }
 0x278   :  { %1450 = vmatprep.subr.bf16.mxu1 %v1670_v48 }
 0x27b   :  { %1452 = vmatpush3.bf16.msra.mxu1 %v1850_v28 }
 0x27c   :  { %1453 = vmatprep.subr.bf16.mxu1 %v1670_v48 }
 0x27f   :  { %1455 = vmatpush3.bf16.msra.mxu1 %v1854_v31 }
 0x280   :  { %1456 = vmatprep.subr.bf16.mxu1 %v1670_v48 }
 0x283   :  { %1458 = vmatpush3.bf16.msra.mxu1 %v1858_v35 }
 0x284   :  { %1459 = vmatprep.subr.bf16.mxu1 %v1670_v48 }
 0x287   :  { %1461 = vmatpush3.bf16.msra.mxu1 %v1862_v39 }
 0x288   :  { %1462 = vmatprep.subr.bf16.mxu1 %v1670_v48 }
 0x28b   :  { %1464 = vmatpush3.bf16.msra.mxu1 %v1866_v42 }
 0x28c   :  { %1465 = vmatprep.subr.bf16.mxu1 %v1670_v48 }
 0x28f   :  { %1467 = vmatpush3.bf16.msra.mxu1 %v1869_v46 }
 0x33f   :  { %v967_v0 = vpop.f32.mrb[8].mxu0 }
 0x340   :  { %v1383_v22 = vpop.f32.mrb[9].mxu0 }
 0x341   :  { %v970_v25 = vpop.f32.mrb[10].mxu0 }
 0x342   :  { %v1384_v28 = vpop.f32.mrb[11].mxu0 }
 0x345   :  { %v1278_v31 = vpop.f32.mrb[4].mxu1 }
 0x346   :  { %v1279_v11 = vpop.f32.mrb[5].mxu1 }
 0x347   :  { %v1280_v12 = vadd.f32 %v1279_v11, %v1278_v31  ;;  %v1281_v35 = vpop.f32.mrb[6].mxu1 }
 0x348   :  { %v1282_v13 = vpop.f32.mrb[7].mxu1 }
 0x349   :  { %v968_v14 = vadd.f32 %v1280_v12, %v967_v0  ;;  %v1283_v16 = vadd.f32 %v1282_v13, %v1281_v35 }
 0x34b   :  { %v974_v39 = vadd.f32 %v968_v14, %v1811_v32  ;;  %v971_v17 = vadd.f32 %v1283_v16, %v970_v25 }
 0x34d   :  { %v975_v42 = vadd.f32 %v971_v17, %v1815_v36  ;;  %v983_v18 = vmul.f32 %v974_v39, %v974_v39 }
 0x34f   :  { %v976_v48 = vadd.f32 %v975_v42, %v974_v39  ;;  %v984_v19 = vmul.f32 %v975_v42, %v975_v42 }
 0x351   :  { %v977_v46 = vrot.slane %v976_v48, 4  ;;  %v985_v20 = vadd.f32 %v984_v19, %v983_v18 }
 0x353   :  { %v978_v21 = vadd.f32 %v977_v46, %v976_v48  ;;  %v986_v23 = vrot.slane %v985_v20, 4 }
 0x355   :  { %v979_v57 = vrot.slane %v978_v21, 2  ;;  %v987_v24 = vadd.f32 %v986_v23, %v985_v20 }
 0x357   :  { %v980_v60 = vadd.f32 %v979_v57, %v978_v21  ;;  %v988_v26 = vrot.slane %v987_v24, 2 }
 0x359   :  { %v981_v27 = vrot.slane %v980_v60, 1  ;;  %v989_v29 = vadd.f32 %v988_v26, %v987_v24 }
 0x35b   :  { %v990_v30 = vrot.slane %v989_v29, 1  ;;  %v982_v33 = vadd.f32 %v981_v27, %v980_v60 }
 0x35d   :  { %v991_v34 = vadd.f32 %v990_v30, %v989_v29 }
 0x35f   :  { %v992_v32 = vsel %vm86_vm2, %v982_v33, %v991_v34 }
 0x360   :  { %v993_v37 = vmul.f32 0.0625, %v992_v32 }
 0x362   :  { %1418 = vmatmul.mubr.f32.vlgmr.msra.gmra.mrb[8].mxu1 %v993_v37 }
 0x435   :  { %v1076_v36 = vpop.f32.mrb[8].mxu1 }
 0x436   :  { %v1080_v38 = vmul.f32 %v1076_v36, %v1076_v36  ;;  %v1419_v40 = vpop.f32.mrb[9].mxu1  ;;  %v1091_v50 = vrot.slane %v1076_v36, %v584_v2 }
 0x438   :  { %v1082_v41 = vrot.slane %v1080_v38, 7  ;;  %v1092_v53 = vsub.f32 %v974_v39, %v1091_v50  ;;  %v1093_v59 = vsub.f32 %v975_v42, %v1091_v50 }
 0x43a   :  { %v1084_v43 = vsub.f32 %v1076_v36, %v1082_v41 }
 0x43c   :  { %v1085_v44 = vmax.f32 %v1084_v43, 0.0 }
 0x43e   :  { %v1086_v47 = vadd.f32 1e-05, %v1085_v44 }
 0x440   :  { %1540 = vrsqrt.f32 %v1086_v47 }
 0x44a   :  { %v1541_v51 = vpop.eup %1540 }
 0x44b   :  { %v1101_v52 = vmul.f32 %v1541_v51, %v1208_v49 }
 0x44d   :  { %v1105_v54 = vrot.slane %v1101_v52, %v598_v5 }
 0x44f   :  { %v1106_v56 = vmul.f32 %v1105_v54, %v1092_v53  ;;  %v1107_v58 = vmul.f32 %v1105_v54, %v1093_v59 }
 0x451   :  { %v1115_v45 = vadd.f32 %v1209_v55, %v1106_v56  ;;  %v1116_v61 = vadd.f32 %v1209_v55, %v1107_v58 }
 0x453   :  { %v1117_v62 = vmax.f32 %v1115_v45, 0.0  ;;  %v1118_v15 = vmax.f32 %v1116_v61, 0.0 }
 0x455   :  { %1119 = vst [vmem:[#allocation11] sm:$0xff] %v1117_v62  ;;  %1120 = vst [vmem:[#allocation11 + $0x8] sm:$0xff] %v1118_v15 }
 0x456   :  { %1641 = shalt.err (!%p1638_p8)
}
 0x457   :  { %s1642_s22 = scalar_lea.hbm %s1973_s8, 256 }
 0x458   :  { %p1643_p9 = scmp.ne.s32.totalorder %s1973_s8, %s1642_s22  ;;  %p1646_p10 = scmp.lt.u32.totalorder %s1642_s22, %s1973_s8 }
 0x45a   :  { %p1648_p11 = pnand %p1646_p10, %p1643_p9 }
 0x45c   :  { %1651 = shalt.err (!%p1648_p11)
}
 0x45d   :  { %1132 = dma.vmem_to_hbm [thread:$0]  %s1127_s19, 256, %s1973_s8, [#allocation5], %s1664_s1, %s1664_s1, %s1665_s28  }
 0x45e   :  { %1658 = dma.done.wait [#allocation5], 256  }
 0x45f   :  { %1659 = vsyncadd [#allocation5], 4294967040 }
 0x460   :  { %1136 = vsyncpa [#allocation4], 1 }
 0x461   :  { %1137 = vsyncpa [#allocation7], 1 }
 0x462   :  { %1138 = vsyncpa [#allocation10], 1 }
 0x463   :  { %1139 = vsyncpa [#allocation5], 1 }

</bundles_post_ra>
